<compile_context>
chip_gen: v6e
topology: v6e:2x2x1
jax: 0.10.0
libtpu: 0.0.40
codegen_flags: <defaults>
</compile_context>

<pallas_src>
import functools

import numpy as np

import jax
import jax.numpy as jnp
from jax.experimental import pallas as pl
from jax.experimental.pallas import tpu as pltpu


# ------------------------------ model config --------------------------------

KERNEL_SIZES = [3, 3, 3, 3, 3]
STRIDES = [1, 1, 1, 1, 1]                     # kernel assumes stride-1 convs
PADDINGS = [1, 1, 1, 1, 0]
CHANNELS = [8, 16, 16, 16, 32]
NUM_CLASSES = 10
HAS_POOL = [True, True, False, False, True]   # layers 1, 2, 5 have MaxPool2d(2, 2)
IN_CHANNELS = 3
LANE = 128                                    # lane-dense width for the fc output
MAXPAD = max(PADDINGS)


def _layer_shapes(in_hw):
    """Static per-layer geometry (all Python ints, resolved at trace time)."""
    H = W = in_hw
    c_in = IN_CHANNELS
    cfgs = []
    for i, c_out in enumerate(CHANNELS):
        k, p, pooled = KERNEL_SIZES[i], PADDINGS[i], HAS_POOL[i]
        assert STRIDES[i] == 1, "fused kernel assumes stride-1 convolutions"
        oh, ow = H + 2 * p - k + 1, W + 2 * p - k + 1
        if pooled:
            assert oh % 2 == 0 and ow % 2 == 0, "2x2/2 pool needs even conv output"
        cfg = dict(H=H, W=W, Cin=c_in, Cout=c_out, k=k, pad=p, pooled=pooled,
                   OH=oh, OW=ow,
                   Hout=oh // 2 if pooled else oh,
                   Wout=ow // 2 if pooled else ow)
        cfgs.append(cfg)
        H, W, c_in = cfg["Hout"], cfg["Wout"], c_out
    assert H == 1 and W == 1, "config must reduce the spatial extent to 1x1 for fc"
    return cfgs


# ------------------------------ fused kernel --------------------------------


def _conv_layer(src_ref, row0, c, w_ref, b_ref, batch):
    """One conv(+ReLU)(+fused 2x2/2 max-pool) layer on the dense 2D H-major layout.

    src_ref: bf16 ref holding the H-zero-padded input activation; rows are ordered
             (h, b) = h*B + b and the padded window starts at row `row0`.
    w_ref:   (KH, W*Cin, N) bf16 banded weights.  For pooled layers the N columns
             are [even output cols | odd output cols].
    b_ref:   (1, N_after_Wpool) f32 bias, pre-tiled along OW.
    Returns f32 (Hout*B, Wout*Cout).
    """
    B = batch
    WC = c["W"] * c["Cin"]
    OH, k = c["OH"], c["k"]

    # KH accumulating MXU dots; each LHS is a contiguous bf16 row-slice of the ref
    # (no reshape, no per-tap cast).
    acc = jnp.dot(src_ref[row0:row0 + OH * B, :WC], w_ref[0],
                  preferred_element_type=jnp.float32)
    for kh in range(1, k):
        acc += jnp.dot(src_ref[row0 + kh * B:row0 + kh * B + OH * B, :WC], w_ref[kh],
                       preferred_element_type=jnp.float32)

    if c["pooled"]:
        nh = acc.shape[-1] // 2
        acc = jnp.maximum(acc[:, :nh], acc[:, nh:])        # W-pool: even vs odd half
    acc = jnp.maximum(acc + b_ref[...], 0.0)               # bias + ReLU (f32 VPU)
    if c["pooled"]:
        nh = acc.shape[-1]
        a4 = acc.reshape(OH // 2, 2, B, nh)                # H-pool: row-pair max
        acc = jnp.maximum(a4[:, 0], a4[:, 1]).reshape(OH // 2 * B, nh)
    return acc


def _alexnet_fused_kernel(*refs, cfgs, batch, maxpad):
    """refs = (x, w0, b0, ..., w4, b4, fc_w, fc_b, out, act_scratch)."""
    n_layers = len(cfgs)
    x_ref = refs[0]
    fcw_ref = refs[1 + 2 * n_layers]
    fcb_ref = refs[2 + 2 * n_layers]
    out_ref = refs[3 + 2 * n_layers]
    scr = refs[4 + 2 * n_layers]

    B = batch
    base = maxpad * B          # activations live at scratch rows [base, base+H*B)

    # Zero the activation scratch once: rows [0, base) never get written again and
    # act as the leading H-padding halo for every interior layer.
    scr[...] = jnp.zeros_like(scr)

    dirty_end = 0              # rows >= dirty_end are guaranteed still zero
    y = None
    for i, c in enumerate(cfgs):
        w_ref, b_ref = refs[1 + 2 * i], refs[2 + 2 * i]
        if i == 0:
            src, row0 = x_ref, 0                   # layer-1 input pre-padded by wrapper
        else:
            src, row0 = scr, base - c["pad"] * B
        y = _conv_layer(src, row0, c, w_ref, b_ref, B)

        if i + 1 < n_layers:
            rows = y.shape[0]
            scr[base:base + rows, :y.shape[1]] = y.astype(scr.dtype)
            halo = cfgs[i + 1]["pad"] * B
            if halo and dirty_end > base + rows:
                # Re-zero trailing halo rows that hold stale data from a wider layer.
                scr[base + rows:base + rows + halo, :] = jnp.zeros(
                    (halo, scr.shape[1]), scr.dtype)
            dirty_end = max(dirty_end, base + rows)

    # Final spatial extent is 1x1 -> (B, C_last); matches torch's x.view(B, -1).
    feat = y.astype(jnp.bfloat16)
    out_ref[...] = (jnp.dot(feat, fcw_ref[...], preferred_element_type=jnp.float32)
                    + fcb_ref[...])


# --------------------------- host-side weight prep ---------------------------


def _banded_weight(w_kh, pad, w_in, ow_list):
    """Block-Toeplitz matrix so that (row-slab @ result) computes one kh tap of a
    stride-1 conv in the merged column layout: input column = iw*Cin + ci, output
    column = o_idx*Cout + co (only the selected ow values, in ow_list order).
    Zero-padding along W is absorbed here (out-of-range taps are omitted)."""
    KW, Cin, Cout = w_kh.shape
    mat = np.zeros((w_in * Cin, len(ow_list) * Cout), np.float32)
    for o_idx, ow in enumerate(ow_list):
        for kw in range(KW):
            iw = ow + kw - pad
            if 0 <= iw < w_in:
                mat[iw * Cin:(iw + 1) * Cin, o_idx * Cout:(o_idx + 1) * Cout] = w_kh[kw]
    return mat


def prepare_params(params, in_hw):
    """HWIO conv weights -> per-kh banded bf16 matmul weights.  Pooled layers get the
    even and odd output columns merged along N (W-pool = max of the two lane halves).
    Biases are pre-tiled along OW; the fc layer is zero-padded to lane-dense N=128."""
    cfgs = _layer_shapes(in_hw)
    layer_weights = []
    for i, c in enumerate(cfgs):
        w = np.asarray(params[f"w{i}"], np.float32)      # (k, k, Cin, Cout)
        b = np.asarray(params[f"b{i}"], np.float32)
        assert w.shape == (c["k"], c["k"], c["Cin"], c["Cout"])
        if c["pooled"]:
            ow_list = list(range(0, c["OW"], 2)) + list(range(1, c["OW"], 2))
            bias = np.tile(b, c["OW"] // 2)[None, :]     # bias added after W-pool
        else:
            ow_list = list(range(c["OW"]))
            bias = np.tile(b, c["OW"])[None, :]
        mats = [_banded_weight(w[kh], c["pad"], c["W"], ow_list) for kh in range(c["k"])]
        wb = jnp.asarray(np.stack(mats, axis=0), jnp.bfloat16)
        layer_weights.append((wb, jnp.asarray(bias, jnp.float32)))
    fc_w = np.zeros((CHANNELS[-1], LANE), np.float32)
    fc_w[:, :NUM_CLASSES] = np.asarray(params["fc_w"], np.float32)
    fc_b = np.zeros((1, LANE), np.float32)
    fc_b[0, :NUM_CLASSES] = np.asarray(params["fc_b"], np.float32)
    return layer_weights, jnp.asarray(fc_w, jnp.bfloat16), jnp.asarray(fc_b, jnp.float32)


# --------------------------------- forward ----------------------------------


@jax.jit
def alexnet_forward(x_nchw, prepped):
    layer_weights, fc_w, fc_b = prepped
    B, C, H, W = x_nchw.shape
    cfgs = _layer_shapes(H)

    # NCHW -> dense 2D H-major layout (row = h*B + b, col = w*Cin + ci), H-padded for
    # layer 1 and cast to bf16 in the wrapper (cheap XLA work, outside the kernel).
    p0 = cfgs[0]["pad"]
    x2 = jnp.transpose(x_nchw, (2, 0, 3, 1)).reshape(H * B, W * C)
    x2 = jnp.pad(x2, ((p0 * B, p0 * B), (0, 0))).astype(jnp.bfloat16)

    # Persistent activation scratch geometry (static).
    scr_rows = MAXPAD * B + max((c["H"] + c["pad"]) * B for c in cfgs[1:])
    scr_cols = max(c["W"] * c["Cin"] for c in cfgs[1:])

    args = [x2]
    for wb, bias in layer_weights:
        args += [wb, bias]
    args += [fc_w, fc_b]

    # Advisory cost estimate (flops counted over the banded matmuls).
    flops = 2 * B * fc_w.shape[0] * fc_w.shape[1]
    bytes_accessed = x2.size * 2 + fc_w.size * 2 + fc_b.size * 4 + B * LANE * 4
    for c, (wb, bias) in zip(cfgs, layer_weights):
        flops += 2 * (c["OH"] * B) * wb.shape[1] * wb.shape[2] * c["k"]
        bytes_accessed += wb.size * 2 + bias.size * 4

    kernel = functools.partial(_alexnet_fused_kernel, cfgs=tuple(cfgs),
                               batch=B, maxpad=MAXPAD)
    vmem_spec = pl.BlockSpec(memory_space=pltpu.MemorySpace.VMEM)

    out = pl.pallas_call(
        kernel,
        out_shape=jax.ShapeDtypeStruct((B, LANE), jnp.float32),
        in_specs=[vmem_spec] * len(args),
        out_specs=vmem_spec,
        scratch_shapes=[pltpu.VMEM((scr_rows, scr_cols), jnp.bfloat16)],
        cost_estimate=pl.CostEstimate(flops=flops, transcendentals=0,
                                      bytes_accessed=bytes_accessed),
    )(*args)
    return out[:, :NUM_CLASSES]


# ----------------------------- params / reference ----------------------------


def init_params(key):
    params = {}
    in_ch = IN_CHANNELS
    keys = jax.random.split(key, 2 * len(CHANNELS) + 2)
    for i, out_ch in enumerate(CHANNELS):
        k = KERNEL_SIZES[i]
        params[f"w{i}"] = 0.1 * jax.random.normal(
            keys[2 * i], (k, k, in_ch, out_ch), jnp.float32)
        params[f"b{i}"] = 0.05 * jax.random.normal(
            keys[2 * i + 1], (out_ch,), jnp.float32)
        in_ch = out_ch
    params["fc_w"] = 0.1 * jax.random.normal(
        keys[-2], (CHANNELS[-1], NUM_CLASSES), jnp.float32)
    params["fc_b"] = 0.05 * jax.random.normal(keys[-1], (NUM_CLASSES,), jnp.float32)
    return params


def reference_forward(x_nchw, params):
    """Plain-XLA f32 reference matching the PyTorch module's forward."""
    x = jnp.transpose(x_nchw, (0, 2, 3, 1)).astype(jnp.float32)
    for i in range(len(CHANNELS)):
        x = jax.lax.conv_general_dilated(
            x, params[f"w{i}"], window_strides=(1, 1),
            padding=[(PADDINGS[i], PADDINGS[i])] * 2,
            dimension_numbers=("NHWC", "HWIO", "NHWC"),
            precision=jax.lax.Precision.HIGHEST)
        x = jnp.maximum(x + params[f"b{i}"], 0.0)
        if HAS_POOL[i]:
            x = jax.lax.reduce_window(
                x, -jnp.inf, jax.lax.max, (1, 2, 2, 1), (1, 2, 2, 1), "VALID")
    x = x.reshape(x.shape[0], -1)
    return x @ params["fc_w"] + params["fc_b"]


# ----------------------------------- main ------------------------------------

if __name__ == "__main__":
    key = jax.random.PRNGKey(0)
    pkey, xkey = jax.random.split(key)
    params = init_params(pkey)
    prepped = prepare_params(params, in_hw=16)

    # batch=2, 3 input channels, 16x16 spatial (NCHW, as in the PyTorch module).
    x = jax.random.normal(xkey, (2, IN_CHANNELS, 16, 16), jnp.float32)

    logits = alexnet_forward(x, prepped)
    jax.block_until_ready(logits)
    assert logits.shape == (2, NUM_CLASSES), logits.shape

    # Numerical self-check against the plain-XLA reference (loose tolerance: the
    # kernel feeds bf16 to the MXU with f32 accumulation).
    ref = reference_forward(x, params)
    err = float(jnp.max(jnp.abs(logits - ref)))
    assert jnp.allclose(logits, ref, atol=5e-2, rtol=5e-2), err

    print("KERNEL_OK")
</pallas_src>

<mosaic_0001>
module attributes {stable_mosaic.version = 11 : i64} {
  func.func @_alexnet_fused_kernel(%arg0: memref<36x48xbf16, #tpu.memory_space<vmem>>, %arg1: memref<3x48x128xbf16, #tpu.memory_space<vmem>>, %arg2: memref<1x64xf32, #tpu.memory_space<vmem>>, %arg3: memref<3x64x128xbf16, #tpu.memory_space<vmem>>, %arg4: memref<1x64xf32, #tpu.memory_space<vmem>>, %arg5: memref<3x64x64xbf16, #tpu.memory_space<vmem>>, %arg6: memref<1x64xf32, #tpu.memory_space<vmem>>, %arg7: memref<3x64x64xbf16, #tpu.memory_space<vmem>>, %arg8: memref<1x64xf32, #tpu.memory_space<vmem>>, %arg9: memref<3x64x64xbf16, #tpu.memory_space<vmem>>, %arg10: memref<1x32xf32, #tpu.memory_space<vmem>>, %arg11: memref<32x128xbf16, #tpu.memory_space<vmem>>, %arg12: memref<1x128xf32, #tpu.memory_space<vmem>>, %arg13: memref<2x128xf32, #tpu.memory_space<vmem>>, %arg14: memref<20x64xbf16, #tpu.memory_space<vmem>>) attributes {dimension_semantics = [], scalar_prefetch = 0 : i64, scratch_operands = 1 : i64, tpu.core_type = #tpu.core_type<tc>} {
    %cst = arith.constant 0.000000e+00 : bf16
    %0 = vector.broadcast %cst : bf16 to vector<20x64xbf16>
    %c0 = arith.constant 0 : index
    %c0_0 = arith.constant 0 : index
    %1 = vector.load %arg14[%c0, %c0_0] : memref<20x64xbf16, #tpu.memory_space<vmem>>, vector<20x64xbf16>
    tpu.vector_store %arg14[%c0, %c0_0], %0 {strides = array<i32>} : memref<20x64xbf16, #tpu.memory_space<vmem>>, vector<20x64xbf16>,
    %c0_1 = arith.constant 0 : index
    %c0_2 = arith.constant 0 : index
    %2 = vector.load %arg0[%c0_1, %c0_2] : memref<36x48xbf16, #tpu.memory_space<vmem>>, vector<32x48xbf16>
    %c0_3 = arith.constant 0 : index
    %c0_4 = arith.constant 0 : index
    %c0_5 = arith.constant 0 : index
    %3 = vector.load %arg1[%c0_3, %c0_4, %c0_5] : memref<3x48x128xbf16, #tpu.memory_space<vmem>>, vector<1x48x128xbf16>
    %4 = vector.shape_cast %3 : vector<1x48x128xbf16> to vector<48x128xbf16>
    %cst_6 = arith.constant dense<0.000000e+00> : vector<32x128xf32>
    %5 = tpu.matmul %2, %4, %cst_6 {dimension_numbers = #tpu.dot_dimension_numbers<[1], [0], [0], [1], [0, 0, 1, 1], [], []>} : vector<32x48xbf16>, vector<48x128xbf16>, vector<32x128xf32> -> vector<32x128xf32>
    %c2 = arith.constant 2 : index
    %c0_7 = arith.constant 0 : index
    %6 = vector.load %arg0[%c2, %c0_7] : memref<36x48xbf16, #tpu.memory_space<vmem>>, vector<32x48xbf16>
    %c1 = arith.constant 1 : index
    %c0_8 = arith.constant 0 : index
    %c0_9 = arith.constant 0 : index
    %7 = vector.load %arg1[%c1, %c0_8, %c0_9] : memref<3x48x128xbf16, #tpu.memory_space<vmem>>, vector<1x48x128xbf16>
    %8 = vector.shape_cast %7 : vector<1x48x128xbf16> to vector<48x128xbf16>
    %cst_10 = arith.constant dense<0.000000e+00> : vector<32x128xf32>
    %9 = tpu.matmul %6, %8, %cst_10 {dimension_numbers = #tpu.dot_dimension_numbers<[1], [0], [0], [1], [0, 0, 1, 1], [], []>} : vector<32x48xbf16>, vector<48x128xbf16>, vector<32x128xf32> -> vector<32x128xf32>
    %10 = arith.addf %5, %9 : vector<32x128xf32>
    %c4 = arith.constant 4 : index
    %c0_11 = arith.constant 0 : index
    %11 = vector.load %arg0[%c4, %c0_11] : memref<36x48xbf16, #tpu.memory_space<vmem>>, vector<32x48xbf16>
    %c2_12 = arith.constant 2 : index
    %c0_13 = arith.constant 0 : index
    %c0_14 = arith.constant 0 : index
    %12 = vector.load %arg1[%c2_12, %c0_13, %c0_14] : memref<3x48x128xbf16, #tpu.memory_space<vmem>>, vector<1x48x128xbf16>
    %13 = vector.shape_cast %12 : vector<1x48x128xbf16> to vector<48x128xbf16>
    %cst_15 = arith.constant dense<0.000000e+00> : vector<32x128xf32>
    %14 = tpu.matmul %11, %13, %cst_15 {dimension_numbers = #tpu.dot_dimension_numbers<[1], [0], [0], [1], [0, 0, 1, 1], [], []>} : vector<32x48xbf16>, vector<48x128xbf16>, vector<32x128xf32> -> vector<32x128xf32>
    %15 = arith.addf %10, %14 : vector<32x128xf32>
    %16 = vector.extract_strided_slice %15 {offsets = [0, 0], sizes = [32, 64], strides = [1, 1]} : vector<32x128xf32> to vector<32x64xf32>
    %17 = vector.extract_strided_slice %15 {offsets = [0, 64], sizes = [32, 64], strides = [1, 1]} : vector<32x128xf32> to vector<32x64xf32>
    %18 = arith.maximumf %16, %17 : vector<32x64xf32>
    %c0_16 = arith.constant 0 : index
    %c0_17 = arith.constant 0 : index
    %19 = vector.load %arg2[%c0_16, %c0_17] : memref<1x64xf32, #tpu.memory_space<vmem>>, vector<1x64xf32>
    %20 = vector.broadcast %19 : vector<1x64xf32> to vector<32x64xf32>
    %21 = arith.addf %18, %20 : vector<32x64xf32>
    %cst_18 = arith.constant 0.000000e+00 : f32
    %22 = vector.broadcast %cst_18 : f32 to vector<32x64xf32>
    %23 = arith.maximumf %21, %22 : vector<32x64xf32>
    %24 = vector.shape_cast %23 : vector<32x64xf32> to vector<8x2x2x64xf32>
    %25 = vector.extract_strided_slice %24 {offsets = [0, 0, 0, 0], sizes = [8, 1, 2, 64], strides = [1, 1, 1, 1]} : vector<8x2x2x64xf32> to vector<8x1x2x64xf32>
    %26 = vector.shape_cast %25 : vector<8x1x2x64xf32> to vector<8x2x64xf32>
    %27 = vector.extract_strided_slice %24 {offsets = [0, 1, 0, 0], sizes = [8, 1, 2, 64], strides = [1, 1, 1, 1]} : vector<8x2x2x64xf32> to vector<8x1x2x64xf32>
    %28 = vector.shape_cast %27 : vector<8x1x2x64xf32> to vector<8x2x64xf32>
    %29 = arith.maximumf %26, %28 : vector<8x2x64xf32>
    %30 = vector.shape_cast %29 : vector<8x2x64xf32> to vector<16x64xf32>
    %31 = arith.truncf %30 : vector<16x64xf32> to vector<16x64xbf16>
    %c2_19 = arith.constant 2 : index
    %c0_20 = arith.constant 0 : index
    %32 = vector.load %arg14[%c2_19, %c0_20] : memref<20x64xbf16, #tpu.memory_space<vmem>>, vector<16x64xbf16>
    tpu.vector_store %arg14[%c2_19, %c0_20], %31 {strides = array<i32>} : memref<20x64xbf16, #tpu.memory_space<vmem>>, vector<16x64xbf16>,
    %c0_21 = arith.constant 0 : index
    %c0_22 = arith.constant 0 : index
    %33 = vector.load %arg14[%c0_21, %c0_22] : memref<20x64xbf16, #tpu.memory_space<vmem>>, vector<16x64xbf16>
    %c0_23 = arith.constant 0 : index
    %c0_24 = arith.constant 0 : index
    %c0_25 = arith.constant 0 : index
    %34 = vector.load %arg3[%c0_23, %c0_24, %c0_25] : memref<3x64x128xbf16, #tpu.memory_space<vmem>>, vector<1x64x128xbf16>
    %35 = vector.shape_cast %34 : vector<1x64x128xbf16> to vector<64x128xbf16>
    %cst_26 = arith.constant dense<0.000000e+00> : vector<16x128xf32>
    %36 = tpu.matmul %33, %35, %cst_26 {dimension_numbers = #tpu.dot_dimension_numbers<[1], [0], [0], [1], [0, 0, 1, 1], [], []>} : vector<16x64xbf16>, vector<64x128xbf16>, vector<16x128xf32> -> vector<16x128xf32>
    %c2_27 = arith.constant 2 : index
    %c0_28 = arith.constant 0 : index
    %37 = vector.load %arg14[%c2_27, %c0_28] : memref<20x64xbf16, #tpu.memory_space<vmem>>, vector<16x64xbf16>
    %c1_29 = arith.constant 1 : index
    %c0_30 = arith.constant 0 : index
    %c0_31 = arith.constant 0 : index
    %38 = vector.load %arg3[%c1_29, %c0_30, %c0_31] : memref<3x64x128xbf16, #tpu.memory_space<vmem>>, vector<1x64x128xbf16>
    %39 = vector.shape_cast %38 : vector<1x64x128xbf16> to vector<64x128xbf16>
    %cst_32 = arith.constant dense<0.000000e+00> : vector<16x128xf32>
    %40 = tpu.matmul %37, %39, %cst_32 {dimension_numbers = #tpu.dot_dimension_numbers<[1], [0], [0], [1], [0, 0, 1, 1], [], []>} : vector<16x64xbf16>, vector<64x128xbf16>, vector<16x128xf32> -> vector<16x128xf32>
    %41 = arith.addf %36, %40 : vector<16x128xf32>
    %c4_33 = arith.constant 4 : index
    %c0_34 = arith.constant 0 : index
    %42 = vector.load %arg14[%c4_33, %c0_34] : memref<20x64xbf16, #tpu.memory_space<vmem>>, vector<16x64xbf16>
    %c2_35 = arith.constant 2 : index
    %c0_36 = arith.constant 0 : index
    %c0_37 = arith.constant 0 : index
    %43 = vector.load %arg3[%c2_35, %c0_36, %c0_37] : memref<3x64x128xbf16, #tpu.memory_space<vmem>>, vector<1x64x128xbf16>
    %44 = vector.shape_cast %43 : vector<1x64x128xbf16> to vector<64x128xbf16>
    %cst_38 = arith.constant dense<0.000000e+00> : vector<16x128xf32>
    %45 = tpu.matmul %42, %44, %cst_38 {dimension_numbers = #tpu.dot_dimension_numbers<[1], [0], [0], [1], [0, 0, 1, 1], [], []>} : vector<16x64xbf16>, vector<64x128xbf16>, vector<16x128xf32> -> vector<16x128xf32>
    %46 = arith.addf %41, %45 : vector<16x128xf32>
    %47 = vector.extract_strided_slice %46 {offsets = [0, 0], sizes = [16, 64], strides = [1, 1]} : vector<16x128xf32> to vector<16x64xf32>
    %48 = vector.extract_strided_slice %46 {offsets = [0, 64], sizes = [16, 64], strides = [1, 1]} : vector<16x128xf32> to vector<16x64xf32>
    %49 = arith.maximumf %47, %48 : vector<16x64xf32>
    %c0_39 = arith.constant 0 : index
    %c0_40 = arith.constant 0 : index
    %50 = vector.load %arg4[%c0_39, %c0_40] : memref<1x64xf32, #tpu.memory_space<vmem>>, vector<1x64xf32>
    %51 = vector.broadcast %50 : vector<1x64xf32> to vector<16x64xf32>
    %52 = arith.addf %49, %51 : vector<16x64xf32>
    %cst_41 = arith.constant 0.000000e+00 : f32
    %53 = vector.broadcast %cst_41 : f32 to vector<16x64xf32>
    %54 = arith.maximumf %52, %53 : vector<16x64xf32>
    %55 = vector.shape_cast %54 : vector<16x64xf32> to vector<4x2x2x64xf32>
    %56 = vector.extract_strided_slice %55 {offsets = [0, 0, 0, 0], sizes = [4, 1, 2, 64], strides = [1, 1, 1, 1]} : vector<4x2x2x64xf32> to vector<4x1x2x64xf32>
    %57 = vector.shape_cast %56 : vector<4x1x2x64xf32> to vector<4x2x64xf32>
    %58 = vector.extract_strided_slice %55 {offsets = [0, 1, 0, 0], sizes = [4, 1, 2, 64], strides = [1, 1, 1, 1]} : vector<4x2x2x64xf32> to vector<4x1x2x64xf32>
    %59 = vector.shape_cast %58 : vector<4x1x2x64xf32> to vector<4x2x64xf32>
    %60 = arith.maximumf %57, %59 : vector<4x2x64xf32>
    %61 = vector.shape_cast %60 : vector<4x2x64xf32> to vector<8x64xf32>
    %62 = arith.truncf %61 : vector<8x64xf32> to vector<8x64xbf16>
    %c2_42 = arith.constant 2 : index
    %c0_43 = arith.constant 0 : index
    %63 = vector.load %arg14[%c2_42, %c0_43] : memref<20x64xbf16, #tpu.memory_space<vmem>>, vector<8x64xbf16>
    tpu.vector_store %arg14[%c2_42, %c0_43], %62 {strides = array<i32>} : memref<20x64xbf16, #tpu.memory_space<vmem>>, vector<8x64xbf16>,
    %cst_44 = arith.constant 0.000000e+00 : bf16
    %64 = vector.broadcast %cst_44 : bf16 to vector<2x64xbf16>
    %c10 = arith.constant 10 : index
    %c0_45 = arith.constant 0 : index
    %65 = vector.load %arg14[%c10, %c0_45] : memref<20x64xbf16, #tpu.memory_space<vmem>>, vector<2x64xbf16>
    tpu.vector_store %arg14[%c10, %c0_45], %64 {strides = array<i32>} : memref<20x64xbf16, #tpu.memory_space<vmem>>, vector<2x64xbf16>,
    %c0_46 = arith.constant 0 : index
    %c0_47 = arith.constant 0 : index
    %66 = vector.load %arg14[%c0_46, %c0_47] : memref<20x64xbf16, #tpu.memory_space<vmem>>, vector<8x64xbf16>
    %c0_48 = arith.constant 0 : index
    %c0_49 = arith.constant 0 : index
    %c0_50 = arith.constant 0 : index
    %67 = vector.load %arg5[%c0_48, %c0_49, %c0_50] : memref<3x64x64xbf16, #tpu.memory_space<vmem>>, vector<1x64x64xbf16>
    %68 = vector.shape_cast %67 : vector<1x64x64xbf16> to vector<64x64xbf16>
    %cst_51 = arith.constant dense<0.000000e+00> : vector<8x64xf32>
    %69 = tpu.matmul %66, %68, %cst_51 {dimension_numbers = #tpu.dot_dimension_numbers<[1], [0], [0], [1], [0, 0, 1, 1], [], []>} : vector<8x64xbf16>, vector<64x64xbf16>, vector<8x64xf32> -> vector<8x64xf32>
    %c2_52 = arith.constant 2 : index
    %c0_53 = arith.constant 0 : index
    %70 = vector.load %arg14[%c2_52, %c0_53] : memref<20x64xbf16, #tpu.memory_space<vmem>>, vector<8x64xbf16>
    %c1_54 = arith.constant 1 : index
    %c0_55 = arith.constant 0 : index
    %c0_56 = arith.constant 0 : index
    %71 = vector.load %arg5[%c1_54, %c0_55, %c0_56] : memref<3x64x64xbf16, #tpu.memory_space<vmem>>, vector<1x64x64xbf16>
    %72 = vector.shape_cast %71 : vector<1x64x64xbf16> to vector<64x64xbf16>
    %cst_57 = arith.constant dense<0.000000e+00> : vector<8x64xf32>
    %73 = tpu.matmul %70, %72, %cst_57 {dimension_numbers = #tpu.dot_dimension_numbers<[1], [0], [0], [1], [0, 0, 1, 1], [], []>} : vector<8x64xbf16>, vector<64x64xbf16>, vector<8x64xf32> -> vector<8x64xf32>
    %74 = arith.addf %69, %73 : vector<8x64xf32>
    %c4_58 = arith.constant 4 : index
    %c0_59 = arith.constant 0 : index
    %75 = vector.load %arg14[%c4_58, %c0_59] : memref<20x64xbf16, #tpu.memory_space<vmem>>, vector<8x64xbf16>
    %c2_60 = arith.constant 2 : index
    %c0_61 = arith.constant 0 : index
    %c0_62 = arith.constant 0 : index
    %76 = vector.load %arg5[%c2_60, %c0_61, %c0_62] : memref<3x64x64xbf16, #tpu.memory_space<vmem>>, vector<1x64x64xbf16>
    %77 = vector.shape_cast %76 : vector<1x64x64xbf16> to vector<64x64xbf16>
    %cst_63 = arith.constant dense<0.000000e+00> : vector<8x64xf32>
    %78 = tpu.matmul %75, %77, %cst_63 {dimension_numbers = #tpu.dot_dimension_numbers<[1], [0], [0], [1], [0, 0, 1, 1], [], []>} : vector<8x64xbf16>, vector<64x64xbf16>, vector<8x64xf32> -> vector<8x64xf32>
    %79 = arith.addf %74, %78 : vector<8x64xf32>
    %c0_64 = arith.constant 0 : index
    %c0_65 = arith.constant 0 : index
    %80 = vector.load %arg6[%c0_64, %c0_65] : memref<1x64xf32, #tpu.memory_space<vmem>>, vector<1x64xf32>
    %81 = vector.broadcast %80 : vector<1x64xf32> to vector<8x64xf32>
    %82 = arith.addf %79, %81 : vector<8x64xf32>
    %cst_66 = arith.constant 0.000000e+00 : f32
    %83 = vector.broadcast %cst_66 : f32 to vector<8x64xf32>
    %84 = arith.maximumf %82, %83 : vector<8x64xf32>
    %85 = arith.truncf %84 : vector<8x64xf32> to vector<8x64xbf16>
    %c2_67 = arith.constant 2 : index
    %c0_68 = arith.constant 0 : index
    %86 = vector.load %arg14[%c2_67, %c0_68] : memref<20x64xbf16, #tpu.memory_space<vmem>>, vector<8x64xbf16>
    tpu.vector_store %arg14[%c2_67, %c0_68], %85 {strides = array<i32>} : memref<20x64xbf16, #tpu.memory_space<vmem>>, vector<8x64xbf16>,
    %cst_69 = arith.constant 0.000000e+00 : bf16
    %87 = vector.broadcast %cst_69 : bf16 to vector<2x64xbf16>
    %c10_70 = arith.constant 10 : index
    %c0_71 = arith.constant 0 : index
    %88 = vector.load %arg14[%c10_70, %c0_71] : memref<20x64xbf16, #tpu.memory_space<vmem>>, vector<2x64xbf16>
    tpu.vector_store %arg14[%c10_70, %c0_71], %87 {strides = array<i32>} : memref<20x64xbf16, #tpu.memory_space<vmem>>, vector<2x64xbf16>,
    %c0_72 = arith.constant 0 : index
    %c0_73 = arith.constant 0 : index
    %89 = vector.load %arg14[%c0_72, %c0_73] : memref<20x64xbf16, #tpu.memory_space<vmem>>, vector<8x64xbf16>
    %c0_74 = arith.constant 0 : index
    %c0_75 = arith.constant 0 : index
    %c0_76 = arith.constant 0 : index
    %90 = vector.load %arg7[%c0_74, %c0_75, %c0_76] : memref<3x64x64xbf16, #tpu.memory_space<vmem>>, vector<1x64x64xbf16>
    %91 = vector.shape_cast %90 : vector<1x64x64xbf16> to vector<64x64xbf16>
    %cst_77 = arith.constant dense<0.000000e+00> : vector<8x64xf32>
    %92 = tpu.matmul %89, %91, %cst_77 {dimension_numbers = #tpu.dot_dimension_numbers<[1], [0], [0], [1], [0, 0, 1, 1], [], []>} : vector<8x64xbf16>, vector<64x64xbf16>, vector<8x64xf32> -> vector<8x64xf32>
    %c2_78 = arith.constant 2 : index
    %c0_79 = arith.constant 0 : index
    %93 = vector.load %arg14[%c2_78, %c0_79] : memref<20x64xbf16, #tpu.memory_space<vmem>>, vector<8x64xbf16>
    %c1_80 = arith.constant 1 : index
    %c0_81 = arith.constant 0 : index
    %c0_82 = arith.constant 0 : index
    %94 = vector.load %arg7[%c1_80, %c0_81, %c0_82] : memref<3x64x64xbf16, #tpu.memory_space<vmem>>, vector<1x64x64xbf16>
    %95 = vector.shape_cast %94 : vector<1x64x64xbf16> to vector<64x64xbf16>
    %cst_83 = arith.constant dense<0.000000e+00> : vector<8x64xf32>
    %96 = tpu.matmul %93, %95, %cst_83 {dimension_numbers = #tpu.dot_dimension_numbers<[1], [0], [0], [1], [0, 0, 1, 1], [], []>} : vector<8x64xbf16>, vector<64x64xbf16>, vector<8x64xf32> -> vector<8x64xf32>
    %97 = arith.addf %92, %96 : vector<8x64xf32>
    %c4_84 = arith.constant 4 : index
    %c0_85 = arith.constant 0 : index
    %98 = vector.load %arg14[%c4_84, %c0_85] : memref<20x64xbf16, #tpu.memory_space<vmem>>, vector<8x64xbf16>
    %c2_86 = arith.constant 2 : index
    %c0_87 = arith.constant 0 : index
    %c0_88 = arith.constant 0 : index
    %99 = vector.load %arg7[%c2_86, %c0_87, %c0_88] : memref<3x64x64xbf16, #tpu.memory_space<vmem>>, vector<1x64x64xbf16>
    %100 = vector.shape_cast %99 : vector<1x64x64xbf16> to vector<64x64xbf16>
    %cst_89 = arith.constant dense<0.000000e+00> : vector<8x64xf32>
    %101 = tpu.matmul %98, %100, %cst_89 {dimension_numbers = #tpu.dot_dimension_numbers<[1], [0], [0], [1], [0, 0, 1, 1], [], []>} : vector<8x64xbf16>, vector<64x64xbf16>, vector<8x64xf32> -> vector<8x64xf32>
    %102 = arith.addf %97, %101 : vector<8x64xf32>
    %c0_90 = arith.constant 0 : index
    %c0_91 = arith.constant 0 : index
    %103 = vector.load %arg8[%c0_90, %c0_91] : memref<1x64xf32, #tpu.memory_space<vmem>>, vector<1x64xf32>
    %104 = vector.broadcast %103 : vector<1x64xf32> to vector<8x64xf32>
    %105 = arith.addf %102, %104 : vector<8x64xf32>
    %cst_92 = arith.constant 0.000000e+00 : f32
    %106 = vector.broadcast %cst_92 : f32 to vector<8x64xf32>
    %107 = arith.maximumf %105, %106 : vector<8x64xf32>
    %108 = arith.truncf %107 : vector<8x64xf32> to vector<8x64xbf16>
    %c2_93 = arith.constant 2 : index
    %c0_94 = arith.constant 0 : index
    %109 = vector.load %arg14[%c2_93, %c0_94] : memref<20x64xbf16, #tpu.memory_space<vmem>>, vector<8x64xbf16>
    tpu.vector_store %arg14[%c2_93, %c0_94], %108 {strides = array<i32>} : memref<20x64xbf16, #tpu.memory_space<vmem>>, vector<8x64xbf16>,
    %c2_95 = arith.constant 2 : index
    %c0_96 = arith.constant 0 : index
    %110 = vector.load %arg14[%c2_95, %c0_96] : memref<20x64xbf16, #tpu.memory_space<vmem>>, vector<4x64xbf16>
    %c0_97 = arith.constant 0 : index
    %c0_98 = arith.constant 0 : index
    %c0_99 = arith.constant 0 : index
    %111 = vector.load %arg9[%c0_97, %c0_98, %c0_99] : memref<3x64x64xbf16, #tpu.memory_space<vmem>>, vector<1x64x64xbf16>
    %112 = vector.shape_cast %111 : vector<1x64x64xbf16> to vector<64x64xbf16>
    %cst_100 = arith.constant dense<0.000000e+00> : vector<4x64xf32>
    %113 = tpu.matmul %110, %112, %cst_100 {dimension_numbers = #tpu.dot_dimension_numbers<[1], [0], [0], [1], [0, 0, 1, 1], [], []>} : vector<4x64xbf16>, vector<64x64xbf16>, vector<4x64xf32> -> vector<4x64xf32>
    %c4_101 = arith.constant 4 : index
    %c0_102 = arith.constant 0 : index
    %114 = vector.load %arg14[%c4_101, %c0_102] : memref<20x64xbf16, #tpu.memory_space<vmem>>, vector<4x64xbf16>
    %c1_103 = arith.constant 1 : index
    %c0_104 = arith.constant 0 : index
    %c0_105 = arith.constant 0 : index
    %115 = vector.load %arg9[%c1_103, %c0_104, %c0_105] : memref<3x64x64xbf16, #tpu.memory_space<vmem>>, vector<1x64x64xbf16>
    %116 = vector.shape_cast %115 : vector<1x64x64xbf16> to vector<64x64xbf16>
    %cst_106 = arith.constant dense<0.000000e+00> : vector<4x64xf32>
    %117 = tpu.matmul %114, %116, %cst_106 {dimension_numbers = #tpu.dot_dimension_numbers<[1], [0], [0], [1], [0, 0, 1, 1], [], []>} : vector<4x64xbf16>, vector<64x64xbf16>, vector<4x64xf32> -> vector<4x64xf32>
    %118 = arith.addf %113, %117 : vector<4x64xf32>
    %c6 = arith.constant 6 : index
    %c0_107 = arith.constant 0 : index
    %119 = vector.load %arg14[%c6, %c0_107] : memref<20x64xbf16, #tpu.memory_space<vmem>>, vector<4x64xbf16>
    %c2_108 = arith.constant 2 : index
    %c0_109 = arith.constant 0 : index
    %c0_110 = arith.constant 0 : index
    %120 = vector.load %arg9[%c2_108, %c0_109, %c0_110] : memref<3x64x64xbf16, #tpu.memory_space<vmem>>, vector<1x64x64xbf16>
    %121 = vector.shape_cast %120 : vector<1x64x64xbf16> to vector<64x64xbf16>
    %cst_111 = arith.constant dense<0.000000e+00> : vector<4x64xf32>
    %122 = tpu.matmul %119, %121, %cst_111 {dimension_numbers = #tpu.dot_dimension_numbers<[1], [0], [0], [1], [0, 0, 1, 1], [], []>} : vector<4x64xbf16>, vector<64x64xbf16>, vector<4x64xf32> -> vector<4x64xf32>
    %123 = arith.addf %118, %122 : vector<4x64xf32>
    %124 = vector.extract_strided_slice %123 {offsets = [0, 0], sizes = [4, 32], strides = [1, 1]} : vector<4x64xf32> to vector<4x32xf32>
    %125 = vector.extract_strided_slice %123 {offsets = [0, 32], sizes = [4, 32], strides = [1, 1]} : vector<4x64xf32> to vector<4x32xf32>
    %126 = arith.maximumf %124, %125 : vector<4x32xf32>
    %c0_112 = arith.constant 0 : index
    %c0_113 = arith.constant 0 : index
    %127 = vector.load %arg10[%c0_112, %c0_113] : memref<1x32xf32, #tpu.memory_space<vmem>>, vector<1x32xf32>
    %128 = vector.broadcast %127 : vector<1x32xf32> to vector<4x32xf32>
    %129 = arith.addf %126, %128 : vector<4x32xf32>
    %cst_114 = arith.constant 0.000000e+00 : f32
    %130 = vector.broadcast %cst_114 : f32 to vector<4x32xf32>
    %131 = arith.maximumf %129, %130 : vector<4x32xf32>
    %132 = vector.shape_cast %131 : vector<4x32xf32> to vector<1x2x2x32xf32>
    %133 = vector.extract_strided_slice %132 {offsets = [0, 0, 0, 0], sizes = [1, 1, 2, 32], strides = [1, 1, 1, 1]} : vector<1x2x2x32xf32> to vector<1x1x2x32xf32>
    %134 = vector.shape_cast %133 : vector<1x1x2x32xf32> to vector<1x2x32xf32>
    %135 = vector.extract_strided_slice %132 {offsets = [0, 1, 0, 0], sizes = [1, 1, 2, 32], strides = [1, 1, 1, 1]} : vector<1x2x2x32xf32> to vector<1x1x2x32xf32>
    %136 = vector.shape_cast %135 : vector<1x1x2x32xf32> to vector<1x2x32xf32>
    %137 = arith.maximumf %134, %136 : vector<1x2x32xf32>
    %138 = vector.shape_cast %137 : vector<1x2x32xf32> to vector<2x32xf32>
    %139 = arith.truncf %138 : vector<2x32xf32> to vector<2x32xbf16>
    %c0_115 = arith.constant 0 : index
    %c0_116 = arith.constant 0 : index
    %140 = vector.load %arg11[%c0_115, %c0_116] : memref<32x128xbf16, #tpu.memory_space<vmem>>, vector<32x128xbf16>
    %cst_117 = arith.constant dense<0.000000e+00> : vector<2x128xf32>
    %141 = tpu.matmul %139, %140, %cst_117 {dimension_numbers = #tpu.dot_dimension_numbers<[1], [0], [0], [1], [0, 0, 1, 1], [], []>} : vector<2x32xbf16>, vector<32x128xbf16>, vector<2x128xf32> -> vector<2x128xf32>
    %c0_118 = arith.constant 0 : index
    %c0_119 = arith.constant 0 : index
    %142 = vector.load %arg12[%c0_118, %c0_119] : memref<1x128xf32, #tpu.memory_space<vmem>>, vector<1x128xf32>
    %143 = vector.broadcast %142 : vector<1x128xf32> to vector<2x128xf32>
    %144 = arith.addf %141, %143 : vector<2x128xf32>
    %c0_120 = arith.constant 0 : index
    %c0_121 = arith.constant 0 : index
    %145 = vector.load %arg13[%c0_120, %c0_121] : memref<2x128xf32, #tpu.memory_space<vmem>>, vector<2x128xf32>
    tpu.vector_store %arg13[%c0_120, %c0_121], %144 {strides = array<i32>} : memref<2x128xf32, #tpu.memory_space<vmem>>, vector<2x128xf32>,
    return
  }
}

</mosaic_0001>

<bundles_post_ra>
// kernel: alexnet_forward.1
= control target key start
LH: loop header
LB: loop body
LE: loop exit
PB: predicated region body
PF: predicated region fallthrough
CT: control target
= control target key end

     0   :  { %vm107_vm0 = vcmask 392192   ;;  %vm83_vm1 = vcmask 1046528   ;;  %vm254_vm2 = vcmask 1045504   ;;  %s2783_s0 = inlined_call_operand.vmem [shape: bf16[36,48], index: 0, kind: input, shape index: {}]   ;;  %s2784_s1 = inlined_call_operand.vmem [shape: bf16[3,48,128], index: 1, kind: input, shape index: {}]   ;;  %s2785_s2 = inlined_call_operand.vmem [shape: f32[1,64], index: 2, kind: input, shape index: {}]   ;;  %s2786_s3 = inlined_call_operand.vmem [shape: bf16[3,64,128], index: 3, kind: input, shape index: {}]   ;;  %s2787_s4 = inlined_call_operand.vmem [shape: f32[1,64], index: 4, kind: input, shape index: {}]   ;;  %s2788_s5 = inlined_call_operand.vmem [shape: bf16[3,64,64], index: 5, kind: input, shape index: {}]   ;;  %s2789_s6 = inlined_call_operand.vmem [shape: f32[1,64], index: 6, kind: input, shape index: {}]   ;;  %s2790_s7 = inlined_call_operand.vmem [shape: bf16[3,64,64], index: 7, kind: input, shape index: {}]   ;;  %s2791_s8 = inlined_call_operand.vmem [shape: f32[1,64], index: 8, kind: input, shape index: {}]   ;;  %s2792_s9 = inlined_call_operand.vmem [shape: bf16[3,64,64], index: 9, kind: input, shape index: {}]   ;;  %s2793_s10 = inlined_call_operand.vmem [shape: f32[1,32], index: 10, kind: input, shape index: {}]   ;;  %s2794_s11 = inlined_call_operand.vmem [shape: bf16[32,128], index: 11, kind: input, shape index: {}]   ;;  %s2795_s12 = inlined_call_operand.vmem [shape: f32[1,128], index: 12, kind: input, shape index: {}]   ;;  %s2796_s13 = inlined_call_operand.hbm [shape: f32[2,128], index: 13, kind: output, shape index: {}]  }
   0x1   :  { %v2238_v0 = vld [vmem:[%s2784_s1 + $0x28] sm:$0xff]   ;;  %v2239_v1 = vld [vmem:[%s2784_s1 + $0x10] sm:$0xff]   ;;  %v2240_v2 = vld [vmem:[%s2784_s1 + $0x20] sm:$0xff]  }
   0x2   :  { %2049 = vmatprep.subr.bf16.mxu0 %v2238_v0  ;;  %2059 = vmatprep.subr.bf16.mxu1 %v2239_v1  ;;  %v2241_v3 = vld [vmem:[%s2784_s1 + $0x8] sm:$0xff]   ;;  %v2242_v4 = vld [vmem:[%s2784_s1 + $0x18] sm:$0xff]   ;;  %v2243_v5 = vld [vmem:[%s2784_s1] sm:$0xff]  }
   0x3   :  { %2050 = vmatpush3.bf16.msra.mxu0 %v2238_v0  ;;  %2060 = vmatpush3.bf16.msra.mxu1 %v2239_v1  ;;  %v52_v6 = vld [vmem:[%s2783_s0 + $0x4] sm:$0xf]  ;;  %v61_v7 = vld [vmem:[%s2783_s0] sm:$0xe]  ;;  %v2245_v8 = vld [vmem:[%s2783_s0 + $0x8] sm:$0xff]  }
   0x4   :  { %2051 = vmatprep.subr.bf16.mxu0 %v2240_v2  ;;  %2061 = vmatprep.subr.bf16.mxu1 %v2241_v3  ;;  %v51_v9 = vld [vmem:[%s2783_s0] sm:$0xf]  ;;  %v1789_v10 = vcombine.low %v61_v7, %v52_v6  ;;  %v2247_v12 = vld [vmem:[%s2783_s0 + $0x10] ss:$0 sps:$4 sm:$0x11]   ;;  %v85_v14 = vrot.slane %v2245_v8, 1 }
   0x5   :  { %v1797_v11 = vcombine.low %v51_v9, %v52_v6  ;;  %v2248_v13 = vld [vmem:[%s2784_s1 + $0x40] sm:$0xff]   ;;  %v87_v16 = vrot.slane %v2247_v12, 1  ;;  %v2249_v17 = vld [vmem:[%s2784_s1 + $0x38] sm:$0xff]   ;;  %v256_v22 = vrot.slane %v2245_v8, 2  ;;  %v2250_v24 = vld [vmem:[%s2784_s1 + $0x30] sm:$0xff]  }
   0x6   :  { %v84_v15 = vrot.slane %v1789_v10, 1  ;;  %v239_v20 = vld [vmem:[%s2783_s0] sm:$0xc]  ;;  %v2252_v23 = vld [vmem:[%s2783_s0 + $0x10] ss:$0 sps:$4 sm:$0x33]  }
   0x7   :  { %2052 = vmatpush3.bf16.msra.mxu0 %v2240_v2  ;;  %2062 = vmatpush3.bf16.msra.mxu1 %v2241_v3  ;;  %v88_v19 = vsel %vm83_vm1, %v85_v14, %v87_v16  ;;  %v1809_v21 = vcombine.low %v239_v20, %v52_v6  ;;  %v258_v26 = vrot.slane %v2252_v23, 2 }
   0x8   :  { %2053 = vmatprep.subr.bf16.mxu0 %v2242_v4  ;;  %2063 = vmatprep.subr.bf16.mxu1 %v2243_v5  ;;  %v86_v18 = vsel %vm83_vm1, %v84_v15, %v85_v14 }
   0x9   :  { %2065 = vmatprep.mubr.msk.bf16.mxu1 %vm107_vm0, %v1797_v11  ;;  %2055 = vmatprep.mubr.msk.bf16.mxu0 %vm107_vm0, %v86_v18  ;;  %v255_v25 = vrot.slane %v1809_v21, 2  ;;  %v259_v28 = vsel %vm254_vm2, %v256_v22, %v258_v26 }
   0xb   :  { %2054 = vmatpush3.bf16.msra.mxu0 %v2242_v4  ;;  %2064 = vmatpush3.bf16.msra.mxu1 %v2243_v5  ;;  %v257_v27 = vsel %vm254_vm2, %v255_v25, %v256_v22 }
   0xc   :  { %2069 = vmatprep.subr.bf16.mxu0 %v2248_v13 }
   0xe   :  { %2056 = vmatmul.mubr.msk.bf16.vlgmr.msra.gmra.mxu0 %vm107_vm0, %v88_v19  ;;  %2066 = vmatmul.mubr.msk.bf16.vlgmr.msra.gmra.mxu1 %vm107_vm0, %v2245_v8 }
   0xf   :  { %2070 = vmatpush3.bf16.msra.mxu0 %v2248_v13  ;;  %2075 = vmatprep.mubr.msk.bf16.mxu0 %vm107_vm0, %v257_v27 }
  0x10   :  { %2071 = vmatprep.subr.bf16.mxu0 %v2249_v17 }
  0x13   :  { %2072 = vmatpush3.bf16.msra.mxu0 %v2249_v17 }
  0x14   :  { %2073 = vmatprep.subr.bf16.mxu0 %v2250_v24 }
  0x17   :  { %2074 = vmatpush3.bf16.msra.mxu0 %v2250_v24 }
  0x1a   :  { %2076 = vmatmul.mubr.msk.bf16.vlgmr.msra.gmra.mxu0 %vm107_vm0, %v259_v28 }
  0x1b   :  { %18 = vsyncpa [#allocation4], 0  ;;  %s2334_s0 = smov 64   ;;  %vm49_vm3 = vcmask 517120   ;;  %v2335_v49 = vmov 0   ;;  %v2253_v50 = vld [vmem:[%s2786_s3 + $0x18] sm:$0xff]   ;;  %v380_v61 = vlaneseq }
  0x1c   :  { %50 = vst.msk [vmem:[#allocation2 + $0x8] sm:$0x3] %vm49_vm3, %v2335_v49  ;;  %v2336_v51 = vmov 0.0   ;;  %vm46_vm4 = vcmask 519168   ;;  %v2254_v52 = vld [vmem:[%s2786_s3 + $0x38] sm:$0xff]   ;;  %v2255_v53 = vld [vmem:[%s2786_s3 + $0x10] sm:$0xff]  }
  0x1d   :  { %2091 = vmatprep.subr.bf16.mxu0 %v2336_v51  ;;  %2079 = vmatprep.subr.bf16.mxu1 %v2336_v51  ;;  %47 = vst.msk [vmem:[#allocation2] sm:$0xf] %vm46_vm4, %v2335_v49  ;;  %48 = vst.msk [vmem:[#allocation2 + $0x4] sm:$0xf] %vm46_vm4, %v2335_v49  ;;  %v2256_v54 = vld [vmem:[%s2786_s3 + $0x30] sm:$0xff]   ;;  %v2257_v55 = vld [vmem:[%s2786_s3 + $0x8] sm:$0xff]  }
  0x1e   :  { %2092 = vmatpush3.bf16.msra.mxu0 %v2253_v50  ;;  %2080 = vmatpush3.bf16.msra.mxu1 %v2254_v52  ;;  %v2258_v56 = vld [vmem:[%s2786_s3 + $0x28] sm:$0xff]   ;;  %v2259_v57 = vld [vmem:[%s2786_s3] sm:$0xff]   ;;  %vm2337_vm5 = vmmov 0   ;;  %v2338_v59 = vmov 1983009808   ;;  %v381_v63 = vshrl.u32 %v380_v61, 7 }
  0x1f   :  { %2093 = vmatprep.subr.bf16.mxu0 %v2336_v51  ;;  %2081 = vmatprep.subr.bf16.mxu1 %v2336_v51  ;;  %v2260_v58 = vld [vmem:[%s2786_s3 + $0x20] sm:$0xff]   ;;  %v378_v60 = vunpack.c.l.s4 %v2338_v59  ;;  %vm518_vm6 = vcmask 1040384   ;;  %vm519_vm7 = vcmask 1044484   ;;  %vm532_vm8 = vcmask 516096   ;;  %s2339_s18 = smov 96   ;;  %s2340_s21 = smov [#allocation3]  }
  0x20   :  { %2099 = vmatprep.mubr.msk.bf16.mxu0 %vm2337_vm5, %v2336_v51  ;;  %2087 = vmatprep.mubr.msk.bf16.mxu1 %vm2337_vm5, %v2336_v51  ;;  %v1816_v0 = vld [vmem:[%s2785_s2] ss:$0 sm:$0xff]  ;;  %vm529_vm9 = vcmask 519169   ;;  %vm520_vm10 = vmor %vm518_vm6, %vm519_vm7  ;;  %vm897_vm11 = vcmask 517121   ;;  %vm590_vm12 = vcmask 523264   ;;  %vm1724_vm13 = vcmask 261120  }
  0x21   :  { %v379_v62 = vunpack.c.0.s8 %v378_v60  ;;  %s1775_s22 = sshll.u32 %s2340_s21, 4  ;;  %s1776_s22 = int_to_ptr.vmem [resolvable:$true] %s1775_s22 }
  0x22   :  { %2094 = vmatpush3.bf16.msra.mxu0 %v2255_v53  ;;  %2082 = vmatpush3.bf16.msra.mxu1 %v2256_v54  ;;  %p2317_p1 = scmp.lt.s32.totalorder %s1776_s22, %s1776_s22 }
  0x23   :  { %2095 = vmatprep.subr.bf16.mxu0 %v2336_v51  ;;  %2083 = vmatprep.subr.bf16.mxu1 %v2336_v51  ;;  %v2525_v4 = vsub.s32 %v379_v62, %v381_v63 }
  0x26   :  { %2096 = vmatpush3.bf16.msra.mxu0 %v2257_v55  ;;  %2084 = vmatpush3.bf16.msra.mxu1 %v2258_v56 }
  0x27   :  { %2097 = vmatprep.subr.bf16.mxu0 %v2336_v51  ;;  %2085 = vmatprep.subr.bf16.mxu1 %v2336_v51 }
  0x2a   :  { %2098 = vmatpush3.bf16.msra.mxu0 %v2259_v57  ;;  %2086 = vmatpush3.bf16.msra.mxu1 %v2260_v58 }
  0x2b   :  { %2115 = vmatprep.subr.bf16.mxu0 %v2336_v51  ;;  %2103 = vmatprep.subr.bf16.mxu1 %v2336_v51 }
  0xce   :  { %v2057_v29 = vpop.f32.mrf.mxu0  ;;  %v2067_v30 = vpop.f32.mrf.mxu1 }
  0xcf   :  { %v233_v36 = vadd.f32 %v2067_v30, %v2057_v29 }
  0xd0   :  { %v148_v31 = vpop.f32.mrf.mxu0  ;;  %v224_v32 = vpop.f32.mrf.mxu1 }
  0xd1   :  { %v225_v38 = vadd.f32 %v224_v32, %v148_v31 }
  0xd2   :  { %v2058_v33 = vpop.f32.mrf.mxu0  ;;  %v2068_v34 = vpop.f32.mrf.mxu1 }
  0xd3   :  { %v236_v42 = vadd.f32 %v2068_v34, %v2058_v33 }
  0xd4   :  { %v151_v35 = vpop.f32.mrf.mxu0  ;;  %v227_v40 = vpop.f32.mrf.mxu1 }
  0xd5   :  { %v228_v45 = vadd.f32 %v227_v40, %v151_v35 }
  0xda   :  { %v2077_v37 = vpop.f32.mrf.mxu0 }
  0xdb   :  { %v335_v39 = vadd.f32 %v2077_v37, %v233_v36 }
  0xdc   :  { %v318_v41 = vpop.f32.mrf.mxu0 }
  0xdd   :  { %v333_v43 = vadd.f32 %v318_v41, %v225_v38  ;;  %345 = vrot.lane.b32.xlu1 %v335_v39, %s2334_s0 }
  0xde   :  { %v2078_v44 = vpop.f32.mrf.mxu0 }
  0xdf   :  { %v2470_v46 = vadd.f32 %v2078_v44, %v236_v42  ;;  %341 = vrot.lane.b32.xlu0 %v333_v43, %s2334_s0 }
  0xe0   :  { %v321_v47 = vpop.f32.mrf.mxu0 }
  0xe1   :  { %v2473_v48 = vadd.f32 %v321_v47, %v228_v45  ;;  %347 = vrot.lane.b32.xlu1 %v2470_v46, %s2334_s0 }
  0xe3   :  { %343 = vrot.lane.b32.xlu0 %v2473_v48, %s2334_s0 }
 0x14f   :  { %v346_v1 = vpop.permute.xlu1 %345 }
 0x150   :  { %v355_v2 = vmax.f32 %v335_v39, %v346_v1 }
 0x151   :  { %v342_v3 = vpop.permute.xlu0 %341 }
 0x152   :  { %v366_v5 = vadd.f32 %v1816_v0, %v355_v2  ;;  %v353_v6 = vmax.f32 %v333_v43, %v342_v3 }
 0x153   :  { %v348_v7 = vpop.permute.xlu1 %347 }
 0x154   :  { %v370_v8 = vmax.f32 %v366_v5, 0.0  ;;  %v364_v9 = vadd.f32 %v1816_v0, %v353_v6  ;;  %v356_v10 = vmax.f32 %v2470_v46, %v348_v7 }
 0x155   :  { %v344_v11 = vpop.permute.xlu0 %343 }
 0x156   :  { %v410_v12 = vcombine.high %v370_v8, %v370_v8  ;;  %v417_v13 = vrot.slane %v370_v8, %v2525_v4  ;;  %v368_v14 = vmax.f32 %v364_v9, 0.0  ;;  %v367_v15 = vadd.f32 %v1816_v0, %v356_v10  ;;  %v2262_v10 = vld [vmem:[%s2786_s3 + $0x58] sm:$0xff]  }
 0x157   :  { %v354_v16 = vmax.f32 %v2473_v48, %v344_v11 }
 0x158   :  { %v424_v17 = vrot.slane %v410_v12, %v2525_v4  ;;  %v376_v18 = vcombine.high %v368_v14, %v368_v14  ;;  %v383_v19 = vrot.slane %v368_v14, %v2525_v4  ;;  %v371_v20 = vmax.f32 %v367_v15, 0.0  ;;  %v2263_v12 = vld [vmem:[%s2786_s3 + $0x50] sm:$0xff]  }
 0x159   :  { %v365_v21 = vadd.f32 %v1816_v0, %v354_v16  ;;  %v425_v22 = vcombine.high %v417_v13, %v417_v13  ;;  %v2265_v16 = vld [vmem:[%s2786_s3 + $0x40] sm:$0xff]  }
 0x15a   :  { %v426_v23 = vcombine.high %v424_v17, %v424_v17  ;;  %v390_v24 = vrot.slane %v376_v18, %v2525_v4  ;;  %v427_v25 = vcombine.high %v371_v20, %v371_v20  ;;  %v434_v26 = vrot.slane %v371_v20, %v2525_v4 }
 0x15b   :  { %v369_v27 = vmax.f32 %v365_v21, 0.0  ;;  %v391_v29 = vcombine.high %v383_v19, %v383_v19  ;;  %v464_v35 = vmax.f32 %v417_v13, %v425_v22  ;;  %v2264_v13 = vld [vmem:[%s2786_s3 + $0x48] sm:$0xff]  }
 0x15c   :  { %v465_v28 = vmax.f32 %v424_v17, %v426_v23  ;;  %v392_v30 = vcombine.high %v390_v24, %v390_v24  ;;  %v441_v31 = vrot.slane %v427_v25, %v2525_v4  ;;  %v442_v32 = vcombine.high %v434_v26, %v434_v26 }
 0x15d   :  { %v393_v33 = vcombine.high %v369_v27, %v369_v27  ;;  %v400_v34 = vrot.slane %v369_v27, %v2525_v4  ;;  %v460_v40 = vmax.f32 %v383_v19, %v391_v29 }
 0x15e   :  { %v461_v36 = vmax.f32 %v390_v24, %v392_v30  ;;  %v443_v37 = vcombine.high %v441_v31, %v441_v31  ;;  %v493_v41 = vcombine.low %v464_v35, %v465_v28  ;;  %v466_v42 = vmax.f32 %v434_v26, %v442_v32 }
 0x15f   :  { %v407_v38 = vrot.slane %v393_v33, %v2525_v4  ;;  %v408_v39 = vcombine.high %v400_v34, %v400_v34 }
 0x160   :  { %v467_v43 = vmax.f32 %v441_v31, %v443_v37  ;;  %v476_v45 = vcombine.low %v460_v40, %v461_v36  ;;  %v501_v50 = vrot.slane %v493_v41, %v2525_v4  ;;  %v2267_v37 = vld [vmem:[%s2788_s5 + $0x18] sm:$0xff]   ;;  %v2270_v40 = vld [vmem:[%s2788_s5 + $0x8] sm:$0xff]   ;;  %v2271_v41 = vld [vmem:[%s2788_s5 + $0x30] sm:$0xff]  }
 0x161   :  { %v409_v44 = vcombine.high %v407_v38, %v407_v38  ;;  %v462_v47 = vmax.f32 %v400_v34, %v408_v39  ;;  %v2269_v39 = vld [vmem:[%s2788_s5 + $0x38] sm:$0xff]  }
 0x162   :  { %v494_v46 = vcombine.low %v466_v42, %v467_v43  ;;  %v484_v54 = vrot.slane %v476_v45, %v2525_v4  ;;  %v2272_v42 = vld [vmem:[%s2788_s5] sm:$0xff]   ;;  %v2273_v43 = vld [vmem:[%s2788_s5 + $0x28] sm:$0xff]  }
 0x163   :  { %v463_v48 = vmax.f32 %v407_v38, %v409_v44  ;;  %v2268_v38 = vld [vmem:[%s2788_s5 + $0x10] sm:$0xff]   ;;  %v2274_v44 = vld [vmem:[%s2788_s5 + $0x20] sm:$0xff]  }
 0x164   :  { %v508_v52 = vrot.slane %v494_v46, %v2525_v4  ;;  %v1855_v45 = vld [vmem:[%s2787_s4] ss:$0 sm:$0xff] }
 0x165   :  { %v477_v53 = vcombine.low %v462_v47, %v463_v48 }
 0x166   :  { %v509_v55 = vcombine.low %v501_v50, %v508_v52 }
 0x167   :  { %v491_v56 = vrot.slane %v477_v53, %v2525_v4 }
 0x168   :  { %v1967_v57 = vpack.c.bf16 %v509_v55, %v509_v55 }
 0x169   :  { %v492_v58 = vcombine.low %v484_v54, %v491_v56 }
 0x16a   :  { %v523_v59 = vrot.slane %v1967_v57, 7 }
 0x16b   :  { %v1966_v60 = vpack.c.bf16 %v492_v58, %v492_v58 }
 0x16c   :  { %v525_v61 = vrot.slane %v523_v59, 4 }
 0x16d   :  { %v521_v62 = vrot.slane %v1966_v60, 7 }
 0x16e   :  { %533 = vst.msk [vmem:[#allocation2 + $0x8] sm:$0x1] %vm532_vm8, %v525_v61 }
 0x16f   :  { %v522_v63 = vrot.slane %v521_v62, 4  ;;  %530 = vst.msk [vmem:[#allocation2] sm:$0xe] %vm529_vm9, %v521_v62 }
 0x171   :  { %v524_v0 = vsel %vm520_vm10, %v522_v63, %v523_v59 }
 0x172   :  { %531 = vst.msk [vmem:[#allocation2 + $0x4] sm:$0xf] %vm46_vm4, %v524_v0 }
 0x175   :  { %v2261_v1 = vld [vmem:[#allocation2 + $0x8] ss:$0 sps:$4 sm:$0x11]  }
 0x176   :  { %v534_v3 = vld [vmem:[#allocation2] sm:$0xf]  ;;  %v564_v9 = vrot.slane %v2261_v1, 1  ;;  %v2266_v17 = vld [vmem:[#allocation2 + $0x8] ss:$0 sps:$4 sm:$0x33]  }
 0x177   :  { %v544_v5 = vld [vmem:[#allocation2] sm:$0xe]  ;;  %v724_v19 = vrot.slane %v2266_v17, 2  ;;  %v2276_v17 = vld [vmem:[%s2788_s5 + $0x58] sm:$0xff]  }
 0x178   :  { %v706_v14 = vld [vmem:[#allocation2] sm:$0xc] }
 0x179   :  { %v535_v2 = vld [vmem:[#allocation2 + $0x4] sm:$0xf] }
 0x17a   :  { %898 = vst.msk [vmem:[#allocation2 + $0x4] sm:$0x2] %vm897_vm11, %v2335_v49  ;;  %v1834_v6 = vcombine.low %v534_v3, %v535_v2  ;;  %v1827_v7 = vcombine.low %v544_v5, %v535_v2  ;;  %v1848_v15 = vcombine.low %v706_v14, %v535_v2 }
 0x17c   :  { %2100 = vmatmul.mubr.msk.bf16.vlgmr.msra.gmra.mxu0 %vm590_vm12, %v1834_v6  ;;  %v563_v8 = vrot.slane %v1827_v7, 1  ;;  %v723_v18 = vrot.slane %v1848_v15, 2 }
 0x17d   :  { %2123 = vmatprep.mubr.msk.bf16.mxu0 %vm2337_vm5, %v2336_v51  ;;  %2116 = vmatpush3.bf16.msra.mxu0 %v2269_v39 }
 0x17e   :  { %v565_v11 = vsel %vm83_vm1, %v563_v8, %v564_v9  ;;  %v725_v20 = vsel %vm254_vm2, %v723_v18, %v724_v19  ;;  %2117 = vmatprep.subr.bf16.mxu0 %v2336_v51 }
 0x17f   :  { %2088 = vmatmul.mubr.msk.bf16.vlgmr.msra.gmra.mxu1 %vm590_vm12, %v565_v11 }
 0x180   :  { %2104 = vmatpush3.bf16.msra.mxu1 %v2262_v10  ;;  %2111 = vmatprep.mubr.msk.bf16.mxu1 %vm2337_vm5, %v2336_v51 }
 0x181   :  { %2105 = vmatprep.subr.bf16.mxu1 %v2336_v51  ;;  %2118 = vmatpush3.bf16.msra.mxu0 %v2271_v41  ;;  %v1890_v41 = vld [vmem:[%s2789_s6] ss:$0 sm:$0xff] }
 0x182   :  { %2119 = vmatprep.subr.bf16.mxu0 %v2336_v51 }
 0x184   :  { %2106 = vmatpush3.bf16.msra.mxu1 %v2263_v12 }
 0x185   :  { %2107 = vmatprep.subr.bf16.mxu1 %v2336_v51  ;;  %2120 = vmatpush3.bf16.msra.mxu0 %v2273_v43 }
 0x186   :  { %2121 = vmatprep.subr.bf16.mxu0 %v2336_v51 }
 0x188   :  { %2108 = vmatpush3.bf16.msra.mxu1 %v2264_v13 }
 0x189   :  { %2109 = vmatprep.subr.bf16.mxu1 %v2336_v51  ;;  %2122 = vmatpush3.bf16.msra.mxu0 %v2274_v44 }
 0x18a   :  { %2139 = vmatprep.subr.bf16.mxu0 %v2336_v51 }
 0x18c   :  { %2110 = vmatpush3.bf16.msra.mxu1 %v2265_v16 }
 0x18d   :  { %2127 = vmatprep.subr.bf16.mxu1 %v2336_v51 }
 0x18f   :  { %2112 = vmatmul.mubr.msk.bf16.vlgmr.msra.gmra.mxu1 %vm590_vm12, %v725_v20  ;;  %v2277_v20 = vld [vmem:[%s2788_s5 + $0x50] sm:$0xff]  }
 0x190   :  { %2135 = vmatprep.mubr.msk.bf16.mxu1 %vm2337_vm5, %v2336_v51  ;;  %2128 = vmatpush3.bf16.msra.mxu1 %v2267_v37 }
 0x191   :  { %2129 = vmatprep.subr.bf16.mxu1 %v2336_v51 }
 0x194   :  { %2130 = vmatpush3.bf16.msra.mxu1 %v2268_v38 }
 0x195   :  { %2131 = vmatprep.subr.bf16.mxu1 %v2336_v51 }
 0x198   :  { %2132 = vmatpush3.bf16.msra.mxu1 %v2270_v40 }
 0x199   :  { %2133 = vmatprep.subr.bf16.mxu1 %v2336_v51 }
 0x19c   :  { %2134 = vmatpush3.bf16.msra.mxu1 %v2272_v42 }
 0x19d   :  { %2151 = vmatprep.subr.bf16.mxu1 %v2336_v51 }
 0x23c   :  { %v699_v21 = vpop.f32.mrf.mxu0 }
 0x23e   :  { %v2101_v22 = vpop.f32.mrf.mxu0 }
 0x23f   :  { %v628_v23 = vpop.f32.mrf.mxu1 }
 0x240   :  { %v702_v24 = vpop.f32.mrf.mxu0  ;;  %v700_v29 = vadd.f32 %v699_v21, %v628_v23  ;;  %v2278_v21 = vld [vmem:[%s2788_s5 + $0x48] sm:$0xff]   ;;  %v2281_v23 = vld [vmem:[%s2790_s7 + $0x18] sm:$0xff]  }
 0x241   :  { %v2089_v25 = vpop.f32.mrf.mxu1 }
 0x242   :  { %v2102_v26 = vpop.f32.mrf.mxu0  ;;  %v2283_v25 = vld [vmem:[%s2790_s7 + $0x38] sm:$0xff]  }
 0x243   :  { %v631_v27 = vpop.f32.mrf.mxu1  ;;  %v2284_v26 = vld [vmem:[%s2790_s7 + $0x8] sm:$0xff]  }
 0x244   :  { %v703_v33 = vadd.f32 %v702_v24, %v631_v27  ;;  %v2282_v24 = vld [vmem:[%s2790_s7 + $0x10] sm:$0xff]  }
 0x245   :  { %v2090_v28 = vpop.f32.mrf.mxu1  ;;  %v2285_v27 = vld [vmem:[%s2790_s7 + $0x30] sm:$0xff]  }
 0x246   :  { %v2286_v28 = vld [vmem:[%s2790_s7] sm:$0xff]  }
 0x24f   :  { %v787_v30 = vpop.f32.mrf.mxu1 }
 0x250   :  { %v794_v31 = vadd.f32 %v787_v30, %v700_v29  ;;  %v2287_v29 = vld [vmem:[%s2790_s7 + $0x28] sm:$0xff]   ;;  %v2288_v30 = vld [vmem:[%s2790_s7 + $0x20] sm:$0xff]  }
 0x251   :  { %v2113_v32 = vpop.f32.mrf.mxu1 }
 0x252   :  { %798 = vrot.lane.b32.xlu0 %v794_v31, %s2334_s0 }
 0x253   :  { %v790_v34 = vpop.f32.mrf.mxu1 }
 0x254   :  { %v795_v35 = vadd.f32 %v790_v34, %v703_v33 }
 0x255   :  { %v2114_v36 = vpop.f32.mrf.mxu1 }
 0x256   :  { %800 = vrot.lane.b32.xlu1 %v795_v35, %s2334_s0 }
 0x2c4   :  { %v799_v46 = vpop.permute.xlu0 %798 }
 0x2c5   :  { %v804_v47 = vmax.f32 %v794_v31, %v799_v46 }
 0x2c7   :  { %v813_v48 = vadd.f32 %v1855_v45, %v804_v47 }
 0x2c8   :  { %v801_v50 = vpop.permute.xlu1 %800 }
 0x2c9   :  { %v815_v52 = vmax.f32 %v813_v48, 0.0  ;;  %v805_v53 = vmax.f32 %v795_v35, %v801_v50 }
 0x2cb   :  { %v819_v54 = vcombine.high %v815_v52, %v815_v52  ;;  %v826_v55 = vrot.slane %v815_v52, %v2525_v4  ;;  %v814_v56 = vadd.f32 %v1855_v45, %v805_v53 }
 0x2cd   :  { %v833_v57 = vrot.slane %v819_v54, %v2525_v4  ;;  %v816_v58 = vmax.f32 %v814_v56, 0.0  ;;  %v834_v59 = vcombine.high %v826_v55, %v826_v55 }
 0x2cf   :  { %v835_v60 = vcombine.high %v833_v57, %v833_v57  ;;  %v836_v61 = vcombine.high %v816_v58, %v816_v58  ;;  %v843_v62 = vrot.slane %v816_v58, %v2525_v4  ;;  %v861_v2 = vmax.f32 %v826_v55, %v834_v59  ;;  %v2290_v55 = vld [vmem:[%s2790_s7 + $0x58] sm:$0xff]   ;;  %v2292_v58 = vld [vmem:[%s2790_s7 + $0x48] sm:$0xff]   ;;  %v2293_v59 = vld [vmem:[%s2790_s7 + $0x40] sm:$0xff]  }
 0x2d1   :  { %v862_v63 = vmax.f32 %v833_v57, %v835_v60  ;;  %v850_v0 = vrot.slane %v836_v61, %v2525_v4  ;;  %v851_v1 = vcombine.high %v843_v62, %v843_v62  ;;  %v2291_v57 = vld [vmem:[%s2790_s7 + $0x50] sm:$0xff]  }
 0x2d3   :  { %v852_v3 = vcombine.high %v850_v0, %v850_v0  ;;  %v869_v5 = vcombine.low %v861_v2, %v862_v63  ;;  %v863_v6 = vmax.f32 %v843_v62, %v851_v1  ;;  %v2295_v62 = vld [vmem:[%s2792_s9 + $0x38] sm:$0xff]   ;;  %v2298_v1 = vld [vmem:[%s2792_s9 + $0x10] sm:$0xff]   ;;  %v2299_v2 = vld [vmem:[%s2792_s9 + $0x28] sm:$0xff]  }
 0x2d4   :  { %v2296_v63 = vld [vmem:[%s2792_s9 + $0x18] sm:$0xff]  }
 0x2d5   :  { %v864_v7 = vmax.f32 %v850_v0, %v852_v3  ;;  %v877_v9 = vrot.slane %v869_v5, %v2525_v4  ;;  %v2297_v0 = vld [vmem:[%s2792_s9 + $0x30] sm:$0xff]   ;;  %v2300_v3 = vld [vmem:[%s2792_s9 + $0x8] sm:$0xff]   ;;  %v2301_v5 = vld [vmem:[%s2792_s9 + $0x20] sm:$0xff]  }
 0x2d7   :  { %v870_v8 = vcombine.low %v863_v6, %v864_v7  ;;  %v2302_v6 = vld [vmem:[%s2792_s9] sm:$0xff]  }
 0x2d9   :  { %v884_v10 = vrot.slane %v870_v8, %v2525_v4 }
 0x2db   :  { %v885_v11 = vcombine.low %v877_v9, %v884_v10 }
 0x2dd   :  { %v1968_v12 = vpack.c.bf16 %v885_v11, %v885_v11 }
 0x2df   :  { %v891_v13 = vrot.slane %v1968_v12, 7 }
 0x2e1   :  { %v892_v14 = vrot.slane %v891_v13, 4  ;;  %895 = vst.msk [vmem:[#allocation2] sm:$0xe] %vm529_vm9, %v891_v13 }
 0x2e3   :  { %896 = vst.msk [vmem:[#allocation2 + $0x4] sm:$0x1] %vm532_vm8, %v892_v14 }
 0x2e8   :  { %v899_v15 = vld [vmem:[#allocation2] sm:$0xf] }
 0x2e9   :  { %2136 = vmatmul.mubr.msk.bf16.vlgmr.msra.gmra.mxu1 %vm590_vm12, %v899_v15 }
 0x2ea   :  { %v2275_v16 = vld [vmem:[#allocation2] sm:$0x1e]   ;;  %2159 = vmatprep.mubr.msk.bf16.mxu1 %vm2337_vm5, %v2336_v51  ;;  %2152 = vmatpush3.bf16.msra.mxu1 %v2283_v25 }
 0x2eb   :  { %v2280_v18 = vld [vmem:[#allocation2] sm:$0x3c]   ;;  %v924_v19 = vrot.slane %v2275_v16, 1  ;;  %2153 = vmatprep.subr.bf16.mxu1 %v2336_v51 }
 0x2ec   :  { %1163 = vst.msk [vmem:[#allocation2 + $0x4] sm:$0x2] %vm897_vm11, %v2335_v49  ;;  %v2279_v49 = vld [vmem:[%s2788_s5 + $0x40] sm:$0xff]   ;;  %v1075_v22 = vrot.slane %v2280_v18, 2 }
 0x2ed   :  { %2124 = vmatmul.mubr.msk.bf16.vlgmr.msra.gmra.mxu0 %vm590_vm12, %v924_v19 }
 0x2ee   :  { %2140 = vmatpush3.bf16.msra.mxu0 %v2276_v17  ;;  %2147 = vmatprep.mubr.msk.bf16.mxu0 %vm2337_vm5, %v2336_v51  ;;  %v1925_v17 = vld [vmem:[%s2791_s8] ss:$0 sm:$0xff] }
 0x2ef   :  { %2141 = vmatprep.subr.bf16.mxu0 %v2336_v51  ;;  %2154 = vmatpush3.bf16.msra.mxu1 %v2285_v27  ;;  %v2304_v27 = vld [vmem:[#allocation2] ss:$0 sps:$4 sm:$0x66]  }
 0x2f0   :  { %2155 = vmatprep.subr.bf16.mxu1 %v2336_v51 }
 0x2f2   :  { %2142 = vmatpush3.bf16.msra.mxu0 %v2277_v20 }
 0x2f3   :  { %2143 = vmatprep.subr.bf16.mxu0 %v2336_v51  ;;  %2156 = vmatpush3.bf16.msra.mxu1 %v2287_v29 }
 0x2f4   :  { %2157 = vmatprep.subr.bf16.mxu1 %v2336_v51 }
 0x2f6   :  { %2144 = vmatpush3.bf16.msra.mxu0 %v2278_v21 }
 0x2f7   :  { %2145 = vmatprep.subr.bf16.mxu0 %v2336_v51  ;;  %2158 = vmatpush3.bf16.msra.mxu1 %v2288_v30  ;;  %v1521_v30 = vrot.slane %v2304_v27, 1 }
 0x2f8   :  { %2175 = vmatprep.subr.bf16.mxu1 %v2336_v51 }
 0x2fa   :  { %2146 = vmatpush3.bf16.msra.mxu0 %v2279_v49 }
 0x2fb   :  { %2163 = vmatprep.subr.bf16.mxu0 %v2336_v51 }
 0x2fd   :  { %2148 = vmatmul.mubr.msk.bf16.vlgmr.msra.gmra.mxu0 %vm590_vm12, %v1075_v22 }
 0x2fe   :  { %2171 = vmatprep.mubr.msk.bf16.mxu0 %vm2337_vm5, %v2336_v51  ;;  %2164 = vmatpush3.bf16.msra.mxu0 %v2281_v23 }
 0x2ff   :  { %2165 = vmatprep.subr.bf16.mxu0 %v2336_v51 }
 0x302   :  { %2166 = vmatpush3.bf16.msra.mxu0 %v2282_v24 }
 0x303   :  { %2167 = vmatprep.subr.bf16.mxu0 %v2336_v51 }
 0x306   :  { %2168 = vmatpush3.bf16.msra.mxu0 %v2284_v26  ;;  %v2303_v26 = vld [vmem:[#allocation2] ss:$0 sps:$4 sm:$0xcc]  }
 0x307   :  { %2169 = vmatprep.subr.bf16.mxu0 %v2336_v51  ;;  %v1450_v29 = vrot.slane %v2303_v26, 2 }
 0x30a   :  { %2170 = vmatpush3.bf16.msra.mxu0 %v2286_v28  ;;  %v2305_v28 = vld [vmem:[%s2792_s9 + $0x58] sm:$0xff]  }
 0x30b   :  { %2187 = vmatprep.subr.bf16.mxu0 %v2336_v51 }
 0x3a9   :  { %v1053_v31 = vpop.f32.mrf.mxu1 }
 0x3ab   :  { %v2137_v32 = vpop.f32.mrf.mxu1 }
 0x3ac   :  { %v2307_v32 = vld [vmem:[%s2792_s9 + $0x48] sm:$0xff]  }
 0x3ad   :  { %v1056_v33 = vpop.f32.mrf.mxu1  ;;  %v986_v34 = vpop.f32.mrf.mxu0 }
 0x3ae   :  { %v1054_v39 = vadd.f32 %v1053_v31, %v986_v34  ;;  %v2306_v31 = vld [vmem:[%s2792_s9 + $0x50] sm:$0xff]   ;;  %v2308_v33 = vld [vmem:[%s2792_s9 + $0x40] sm:$0xff]  }
 0x3af   :  { %v2138_v35 = vpop.f32.mrf.mxu1  ;;  %v2125_v36 = vpop.f32.mrf.mxu0 }
 0x3b1   :  { %v989_v37 = vpop.f32.mrf.mxu0 }
 0x3b3   :  { %v2126_v38 = vpop.f32.mrf.mxu0 }
 0x3bd   :  { %v1137_v40 = vpop.f32.mrf.mxu0 }
 0x3be   :  { %v1143_v42 = vadd.f32 %v1137_v40, %v1054_v39 }
 0x3bf   :  { %v2149_v43 = vpop.f32.mrf.mxu0 }
 0x3c0   :  { %v1151_v44 = vadd.f32 %v1890_v41, %v1143_v42 }
 0x3c1   :  { %v1140_v45 = vpop.f32.mrf.mxu0 }
 0x3c2   :  { %v1152_v46 = vmax.f32 %v1151_v44, 0.0  ;;  %v2310_v44 = vld [vmem:[%s2794_s11 + $0x8] sm:$0xff]  }
 0x3c3   :  { %v2150_v47 = vpop.f32.mrf.mxu0 }
 0x3c4   :  { %v1969_v48 = vpack.c.bf16 %v1152_v46, %v1152_v46  ;;  %v2311_v47 = vld [vmem:[%s2794_s11] sm:$0xff]  }
 0x3c6   :  { %v1157_v50 = vrot.slane %v1969_v48, 7 }
 0x3c8   :  { %v1158_v52 = vrot.slane %v1157_v50, 4  ;;  %1161 = vst.msk [vmem:[#allocation2] sm:$0xe] %vm529_vm9, %v1157_v50 }
 0x3ca   :  { %1162 = vst.msk [vmem:[#allocation2 + $0x4] sm:$0x1] %vm532_vm8, %v1158_v52 }
 0x3cf   :  { %v1164_v53 = vld [vmem:[#allocation2] sm:$0xf] }
 0x3d0   :  { %2172 = vmatmul.mubr.msk.bf16.vlgmr.msra.gmra.mxu0 %vm590_vm12, %v1164_v53 }
 0x3d1   :  { %v2289_v54 = vld [vmem:[#allocation2] sm:$0x1e]   ;;  %2195 = vmatprep.mubr.msk.bf16.mxu0 %vm2337_vm5, %v2336_v51  ;;  %2188 = vmatpush3.bf16.msra.mxu0 %v2295_v62  ;;  %v1962_v62 = vld [vmem:[%s2795_s12] ss:$0 sm:$0xff] }
 0x3d2   :  { %v1189_v56 = vrot.slane %v2289_v54, 1  ;;  %v2294_v60 = vld [vmem:[#allocation2] sm:$0x3c]   ;;  %2189 = vmatprep.subr.bf16.mxu0 %v2336_v51  ;;  %v1961_v54 = vld [vmem:[%s2793_s10] ss:$0 sm:$0xff]  ;;  %s2312_s10 = scalar_lea.vmem %s1776_s22, 32 }
 0x3d3   :  { %v1340_v61 = vrot.slane %v2294_v60, 2  ;;  %p2313_p0 = scmp.ne.s32.totalorder %s1776_s22, %s2312_s10  ;;  %p2318_p2 = scmp.lt.s32.totalorder %s2312_s10, %s2312_s10 }
 0x3d4   :  { %2160 = vmatmul.mubr.msk.bf16.vlgmr.msra.gmra.mxu1 %vm590_vm12, %v1189_v56 }
 0x3d5   :  { %2176 = vmatpush3.bf16.msra.mxu1 %v2290_v55  ;;  %2183 = vmatprep.mubr.msk.bf16.mxu1 %vm2337_vm5, %v2336_v51  ;;  %p2319_p3 = por %p2318_p2, %p2317_p1 }
 0x3d6   :  { %2177 = vmatprep.subr.bf16.mxu1 %v2336_v51  ;;  %2190 = vmatpush3.bf16.msra.mxu0 %v2297_v0 }
 0x3d7   :  { %2191 = vmatprep.subr.bf16.mxu0 %v2336_v51  ;;  %p2320_p4 = pnand %p2319_p3, %p2313_p0 }
 0x3d9   :  { %2178 = vmatpush3.bf16.msra.mxu1 %v2291_v57 }
 0x3da   :  { %2179 = vmatprep.subr.bf16.mxu1 %v2336_v51  ;;  %2192 = vmatpush3.bf16.msra.mxu0 %v2299_v2 }
 0x3db   :  { %2193 = vmatprep.subr.bf16.mxu0 %v2336_v51 }
 0x3dd   :  { %2180 = vmatpush3.bf16.msra.mxu1 %v2292_v58 }
 0x3de   :  { %2181 = vmatprep.subr.bf16.mxu1 %v2336_v51  ;;  %2194 = vmatpush3.bf16.msra.mxu0 %v2301_v5 }
 0x3df   :  { %2211 = vmatprep.subr.bf16.mxu0 %v2336_v51 }
 0x3e1   :  { %2182 = vmatpush3.bf16.msra.mxu1 %v2293_v59  ;;  %2196 = vmatmul.mubr.msk.bf16.vlgmr.msra.gmra.mxu0 %vm590_vm12, %v1450_v29 }
 0x3e2   :  { %2199 = vmatprep.subr.bf16.mxu1 %v2336_v51  ;;  %2212 = vmatpush3.bf16.msra.mxu0 %v2305_v28 }
 0x3e3   :  { %2213 = vmatprep.subr.bf16.mxu0 %v2336_v51  ;;  %2219 = vmatprep.mubr.msk.bf16.mxu0 %vm2337_vm5, %v2336_v51 }
 0x3e4   :  { %2184 = vmatmul.mubr.msk.bf16.vlgmr.msra.gmra.mxu1 %vm590_vm12, %v1340_v61 }
 0x3e5   :  { %2207 = vmatprep.mubr.msk.bf16.mxu1 %vm2337_vm5, %v2336_v51  ;;  %2200 = vmatpush3.bf16.msra.mxu1 %v2296_v63 }
 0x3e6   :  { %2201 = vmatprep.subr.bf16.mxu1 %v2336_v51  ;;  %2214 = vmatpush3.bf16.msra.mxu0 %v2306_v31 }
 0x3e7   :  { %2215 = vmatprep.subr.bf16.mxu0 %v2336_v51 }
 0x3e9   :  { %2202 = vmatpush3.bf16.msra.mxu1 %v2298_v1 }
 0x3ea   :  { %2203 = vmatprep.subr.bf16.mxu1 %v2336_v51  ;;  %2216 = vmatpush3.bf16.msra.mxu0 %v2307_v32 }
 0x3eb   :  { %2217 = vmatprep.subr.bf16.mxu0 %v2336_v51 }
 0x3ed   :  { %2204 = vmatpush3.bf16.msra.mxu1 %v2300_v3 }
 0x3ee   :  { %2205 = vmatprep.subr.bf16.mxu1 %v2336_v51  ;;  %2218 = vmatpush3.bf16.msra.mxu0 %v2308_v33 }
 0x3f1   :  { %2206 = vmatpush3.bf16.msra.mxu1 %v2302_v6 }
 0x3f2   :  { %2223 = vmatprep.subr.bf16.mxu1 %v2336_v51 }
 0x3f4   :  { %2208 = vmatmul.mubr.msk.bf16.vlgmr.msra.gmra.mxu1 %vm590_vm12, %v1521_v30 }
 0x3f5   :  { %2227 = vmatprep.mubr.msk.bf16.mxu1 %vm2337_vm5, %v2336_v51  ;;  %2224 = vmatpush3.bf16.msra.mxu1 %v2310_v44 }
 0x3f6   :  { %2225 = vmatprep.subr.bf16.mxu1 %v2336_v51 }
 0x3f9   :  { %2226 = vmatpush3.bf16.msra.mxu1 %v2311_v47 }
 0x490   :  { %v1318_v7 = vpop.f32.mrf.mxu0 }
 0x492   :  { %v2173_v8 = vpop.f32.mrf.mxu0 }
 0x494   :  { %v1321_v9 = vpop.f32.mrf.mxu0  ;;  %v1251_v10 = vpop.f32.mrf.mxu1 }
 0x495   :  { %v1319_v15 = vadd.f32 %v1318_v7, %v1251_v10 }
 0x496   :  { %v2174_v11 = vpop.f32.mrf.mxu0  ;;  %v2161_v12 = vpop.f32.mrf.mxu1 }
 0x498   :  { %v1254_v13 = vpop.f32.mrf.mxu1 }
 0x49a   :  { %v2162_v14 = vpop.f32.mrf.mxu1 }
 0x4a1   :  { %v1512_v36 = vpop.f32.mrf.mxu0 }
 0x4a3   :  { %v2197_v38 = vpop.f32.mrf.mxu0 }
 0x4a4   :  { %v1402_v16 = vpop.f32.mrf.mxu1 }
 0x4a5   :  { %v1408_v18 = vadd.f32 %v1402_v16, %v1319_v15  ;;  %v1515_v40 = vpop.f32.mrf.mxu0 }
 0x4a6   :  { %v2185_v19 = vpop.f32.mrf.mxu1 }
 0x4a7   :  { %v1416_v20 = vadd.f32 %v1925_v17, %v1408_v18  ;;  %v2198_v42 = vpop.f32.mrf.mxu0 }
 0x4a8   :  { %v1405_v21 = vpop.f32.mrf.mxu1 }
 0x4a9   :  { %v1417_v49 = vmax.f32 %v1416_v20, 0.0 }
 0x4aa   :  { %v2186_v22 = vpop.f32.mrf.mxu1 }
 0x4ab   :  { %v1970_v23 = vpack.c.bf16 %v1417_v49, %v1417_v49 }
 0x4ad   :  { %v1422_v24 = vrot.slane %v1970_v23, 7 }
 0x4af   :  { %v1423_v25 = vrot.slane %v1422_v24, 4  ;;  %1426 = vst.msk [vmem:[#allocation2] sm:$0xe] %vm529_vm9, %v1422_v24 }
 0x4b1   :  { %1427 = vst.msk [vmem:[#allocation2 + $0x4] sm:$0x1] %vm532_vm8, %v1423_v25 }
 0x4b4   :  { %v1583_v37 = vpop.f32.mrf.mxu1 }
 0x4b5   :  { %v1584_v45 = vadd.f32 %v1583_v37, %v1512_v36 }
 0x4b6   :  { %v2209_v39 = vpop.f32.mrf.mxu1 }
 0x4b8   :  { %v2309_v34 = vld [vmem:[#allocation2] sm:$0x18]   ;;  %v1586_v41 = vpop.f32.mrf.mxu1 }
 0x4b9   :  { %v1605_v35 = vrot.slane %v2309_v34, 3 }
 0x4ba   :  { %v2210_v43 = vpop.f32.mrf.mxu1 }
 0x4bb   :  { %2220 = vmatmul.mubr.msk.bf16.vlgmr.msra.gmra.mxu0 %vm590_vm12, %v1605_v35 }
 0x57b   :  { %v1667_v46 = vpop.f32.mrf.mxu0 }
 0x57c   :  { %v1673_v48 = vadd.f32 %v1667_v46, %v1584_v45 }
 0x57d   :  { %v2221_v50 = vpop.f32.mrf.mxu0 }
 0x57e   :  { %1675 = vrot.lane.b32.xlu0 %v1673_v48, %s2339_s18 }
 0x57f   :  { %v1670_v52 = vpop.f32.mrf.mxu0 }
 0x581   :  { %v2222_v53 = vpop.f32.mrf.mxu0 }
 0x5f0   :  { %v1676_v55 = vpop.permute.xlu0 %1675 }
 0x5f1   :  { %v1678_v56 = vmax.f32 %v1673_v48, %v1676_v55 }
 0x5f3   :  { %v1686_v57 = vadd.f32 %v1961_v54, %v1678_v56 }
 0x5f5   :  { %v1687_v51 = vmax.f32 %v1686_v57, 0.0 }
 0x5f7   :  { %v1695_v58 = vrot.slane %v1687_v51, %v2525_v4 }
 0x5f9   :  { %v1696_v59 = vcombine.high %v1695_v58, %v1695_v58 }
 0x5fb   :  { %v1699_v60 = vmax.f32 %v1695_v58, %v1696_v59 }
 0x5fd   :  { %v1700_v61 = vpack.c.bf16 %v1699_v60, %v1699_v60 }
 0x5ff   :  { %2228 = vmatmul.mubr.msk.bf16.vlgmr.msra.gmra.mxu1 %vm1724_vm13, %v1700_v61 }
 0x6bf   :  { %v1762_v63 = vpop.f32.mrf.mxu1 }
 0x6c0   :  { %v1763_v0 = vadd.f32 %v1962_v62, %v1762_v63 }
 0x6c1   :  { %v2229_v1 = vpop.f32.mrf.mxu1 }
 0x6c2   :  { %1768 = vst [vmem:[#allocation3] sm:$0x3] %v1763_v0 }
 0x6c3   :  { %v1765_v2 = vpop.f32.mrf.mxu1 }
 0x6c4   :  { %2323 = shalt.err (!%p2320_p4)
}
 0x6c5   :  { %1778 = dma.vmem_to_hbm [thread:$0]  %s1776_s22, 32, %s2796_s13, [#allocation4]   ;;  %v2230_v4 = vpop.f32.mrf.mxu1 }
 0x6c6   :  { %2332 = dma.done.wait [#allocation4], 32  }
 0x6c7   :  { %2333 = vsyncadd [#allocation4], 4294967264 }
 0x6c8   :  { %1782 = vsyncpa [#allocation4], 1 }

</bundles_post_ra>
